<compile_context>
chip_gen: v6e
topology: v6e:2x2x1
jax: 0.10.0
libtpu: 0.0.40
codegen_flags: <defaults>
</compile_context>

<pallas_src>
from functools import partial

import numpy as np

import jax
import jax.numpy as jnp
from jax.experimental import pallas as pl
from jax.experimental.pallas import tpu as pltpu


def _conv_ps_prelu_kernel(x_ref, w_ref, b_ref, a_ref, o_ref):
    # x_ref: (1, Hp, Wp*Cin)    bf16 padded, channel-folded input rows (one image)
    # w_ref: (k, Wp*Cin, Ncol)  bf16 banded weights; Ncol = C*W*r*r (PixelShuffle and
    #                           the output-channel axis folded into the column order)
    # b_ref: (1, Ncol)          f32 bias permuted to the same column ordering
    # a_ref: (1, 1)             f32 PReLU slope (SMEM)
    # o_ref: (1, H, Ncol)       f32 output rows, already in shuffled column order
    k = w_ref.shape[0]
    h_out = o_ref.shape[1]

    # k row-tap MXU matmuls; taps sliced directly off the ref, accumulator starts
    # with the dy=0 product (no zeros-init VALU pass).
    acc = jnp.dot(x_ref[0, 0:h_out, :], w_ref[0],
                  preferred_element_type=jnp.float32)
    for dy in range(1, k):                       # static unroll (k is tiny)
        acc = acc + jnp.dot(x_ref[0, dy:dy + h_out, :], w_ref[dy],
                            preferred_element_type=jnp.float32)

    acc = acc + b_ref[...]                       # bias once, f32
    alpha = a_ref[0, 0]                          # scalar from SMEM
    acc = jnp.where(acc > 0, acc, alpha * acc)   # PReLU, f32 epilogue
    o_ref[0] = acc.astype(o_ref.dtype)


def prepare_scale_pixel_conv_params(w_oihw, bias, width, scale_factor):
    """Host-side, run ONCE per (weights, width): banded weight matrix with PixelShuffle
    and the output-channel axis folded into its columns, plus the permuted bias.
    Hoisted out of the per-call path (cache this in a real model)."""
    w_np = np.asarray(w_oihw, np.float32)
    b_np = np.asarray(bias, np.float32)
    cout, cin, k, _ = w_np.shape
    r = scale_factor
    c = cout // (r * r)
    p = k // 2
    wpc = (width + 2 * p) * cin
    ncol = c * width * r * r

    co = np.arange(cout)
    c_of, i_of, j_of = co // (r * r), (co % (r * r)) // r, co % r
    CO, CI, DY, DX, WW = np.meshgrid(co, np.arange(cin), np.arange(k),
                                     np.arange(k), np.arange(width), indexing="ij")
    q_idx = (WW + DX) * cin + CI
    col_idx = c_of[CO] * (width * r * r) + i_of[CO] * (width * r) + WW * r + j_of[CO]

    # wmat[dy, (w+dx)*Cin + ci, c*(W*r*r) + i*(W*r) + w*r + j] = W[c*r*r + i*r + j, ci, dy, dx]
    wmat = np.zeros((k, wpc, ncol), np.float32)
    wmat[DY.ravel(), q_idx.ravel(), col_idx.ravel()] = w_np[
        CO.ravel(), CI.ravel(), DY.ravel(), DX.ravel()]

    # bvec[col] = bias[c*r*r + i*r + j], columns ordered (c, i, w, j).
    bvec = np.broadcast_to(b_np.reshape(c, r, 1, r),
                           (c, r, width, r)).reshape(1, ncol)

    return jnp.asarray(wmat, jnp.bfloat16), jnp.asarray(bvec, jnp.float32)


@partial(jax.jit, static_argnames=("scale_factor", "kernel_size"))
def scale_pixel_conv_block(x_nchw, wmat, bvec, alpha, *, scale_factor, kernel_size):
    """Forward pass matching torch: Conv2d(pad=k//2) -> PixelShuffle -> PReLU."""
    n, cin, h, w = x_nchw.shape
    r, k = scale_factor, kernel_size
    p = k // 2
    hp = h + 2 * p
    wpc = (w + 2 * p) * cin
    ncol = cin * w * r * r
    assert wmat.shape == (k, wpc, ncol) and bvec.shape == (1, ncol)

    # NCHW -> padded, channel-folded rows (N, Hp, Wp*Cin), bf16 MXU operand.
    # TODO(synk): a raw-NCHW read with in-kernel halo handling would remove this
    # last wrapper-side pass over the input.
    x_fold = jnp.pad(jnp.transpose(x_nchw, (0, 2, 3, 1)),
                     ((0, 0), (p, p), (p, p), (0, 0))).reshape(n, hp, wpc)
    x_fold = x_fold.astype(jnp.bfloat16)

    alpha_smem = jnp.asarray(alpha, jnp.float32).reshape(1, 1)

    out_flat = pl.pallas_call(
        _conv_ps_prelu_kernel,
        out_shape=jax.ShapeDtypeStruct((n, h, ncol), jnp.float32),
        grid=(n,),
        in_specs=[
            pl.BlockSpec((1, hp, wpc), lambda i: (i, 0, 0)),
            pl.BlockSpec((k, wpc, ncol), lambda i: (0, 0, 0)),   # resident weights
            pl.BlockSpec((1, ncol), lambda i: (0, 0)),           # resident bias
            pl.BlockSpec(memory_space=pltpu.MemorySpace.SMEM),   # PReLU slope
        ],
        out_specs=pl.BlockSpec((1, h, ncol), lambda i: (i, 0, 0)),
        compiler_params=pltpu.CompilerParams(
            dimension_semantics=("parallel",)),   # 2 parallel blocks -> both v7x TCs
    )(x_fold, wmat, bvec, alpha_smem)

    # Columns are ordered (c, i, w, j): tiny transpose of the small output plus
    # free reshapes -> final NCHW pixel-shuffled layout (N, C, H*r, W*r).
    out = out_flat.reshape(n, h, cin, r, w * r)
    return jnp.transpose(out, (0, 2, 1, 3, 4)).reshape(n, cin, h * r, w * r)


def _reference_forward_np(x, w, b, alpha, r):
    """Plain numpy reference: Conv2d(pad=k//2) -> PixelShuffle -> PReLU, f32 accum."""
    n, cin, h, wid = x.shape
    cout, _, k, _ = w.shape
    p = k // 2
    xp = np.pad(x, ((0, 0), (0, 0), (p, p), (p, p)))
    conv = np.zeros((n, cout, h, wid), np.float32)
    for dy in range(k):
        for dx in range(k):
            conv += np.einsum("nchw,oc->nohw",
                              xp[:, :, dy:dy + h, dx:dx + wid], w[:, :, dy, dx])
    conv += b[None, :, None, None]
    c = cout // (r * r)
    ps = conv.reshape(n, c, r, r, h, wid).transpose(0, 1, 4, 2, 5, 3)
    ps = ps.reshape(n, c, h * r, wid * r)
    return np.where(ps > 0, ps, alpha * ps)


if __name__ == "__main__":
    # Module hyperparameters (small): in_channels=4, scale_factor=2, kernel=3.
    in_channels, scale_factor, kernel_size = 4, 2, 3
    out_channels = in_channels * scale_factor ** 2
    n, h, w = 2, 16, 16

    key = jax.random.PRNGKey(0)
    kx, kw, kb = jax.random.split(key, 3)
    x = jax.random.normal(kx, (n, in_channels, h, w), jnp.float32)
    wgt = 0.1 * jax.random.normal(
        kw, (out_channels, in_channels, kernel_size, kernel_size), jnp.float32)
    bias = 0.05 * jax.random.normal(kb, (out_channels,), jnp.float32)
    alpha = jnp.float32(0.25)  # nn.PReLU() default single-parameter init

    # Banded weight / permuted bias built once (hoisted out of the per-call path).
    wmat, bvec = prepare_scale_pixel_conv_params(wgt, bias, w, scale_factor)

    out = scale_pixel_conv_block(x, wmat, bvec, alpha,
                                 scale_factor=scale_factor, kernel_size=kernel_size)
    out = jax.block_until_ready(out)

    # Reference with the same bf16-rounded matmul operands (the kernel feeds the MXU
    # bf16 and accumulates f32); bias + PReLU epilogue is f32 in both paths.
    x_bf = np.asarray(x.astype(jnp.bfloat16).astype(jnp.float32))
    w_bf = np.asarray(wgt.astype(jnp.bfloat16).astype(jnp.float32))
    ref = _reference_forward_np(x_bf, w_bf, np.asarray(bias), float(alpha), scale_factor)

    assert out.shape == (n, in_channels, h * scale_factor, w * scale_factor)
    out_np = np.asarray(out)
    max_err = float(np.max(np.abs(out_np - ref)))
    assert np.allclose(out_np, ref, atol=1e-3, rtol=1e-3), f"mismatch vs reference: {max_err}"

    print("KERNEL_OK")
</pallas_src>

<mosaic_0001>
module attributes {stable_mosaic.version = 11 : i64} {
  func.func @_conv_ps_prelu_kernel(%arg0: i32, %arg1: memref<1x18x72xbf16, #tpu.memory_space<vmem>>, %arg2: memref<3x72x256xbf16, #tpu.memory_space<vmem>>, %arg3: memref<1x256xf32, #tpu.memory_space<vmem>>, %arg4: memref<1x1xf32, #tpu.memory_space<smem>>, %arg5: memref<1x16x256xf32, #tpu.memory_space<vmem>>) attributes {dimension_semantics = [#tpu.dimension_semantics<parallel>], iteration_bounds = array<i64: 2>, scalar_prefetch = 0 : i64, scratch_operands = 0 : i64, tpu.core_type = #tpu.core_type<tc>, window_params = [{transform_indices = @transform_0, window_bounds = array<i64: 1, 18, 72>}, {pipeline_mode = #tpu.pipeline_mode<synchronous>, transform_indices = @transform_1, window_bounds = array<i64: 3, 72, 256>}, {pipeline_mode = #tpu.pipeline_mode<synchronous>, transform_indices = @transform_2, window_bounds = array<i64: 1, 256>}, {transform_indices = @transform_3, window_bounds = array<i64: 1, 1>}, {transform_indices = @transform_4, window_bounds = array<i64: 1, 16, 256>}]} {
    %c0 = arith.constant 0 : index
    %c0_0 = arith.constant 0 : index
    %c0_1 = arith.constant 0 : index
    %0 = vector.load %arg1[%c0, %c0_0, %c0_1] : memref<1x18x72xbf16, #tpu.memory_space<vmem>>, vector<1x16x72xbf16>
    %1 = vector.shape_cast %0 : vector<1x16x72xbf16> to vector<16x72xbf16>
    %c0_2 = arith.constant 0 : index
    %c0_3 = arith.constant 0 : index
    %c0_4 = arith.constant 0 : index
    %2 = vector.load %arg2[%c0_2, %c0_3, %c0_4] : memref<3x72x256xbf16, #tpu.memory_space<vmem>>, vector<1x72x256xbf16>
    %3 = vector.shape_cast %2 : vector<1x72x256xbf16> to vector<72x256xbf16>
    %cst = arith.constant dense<0.000000e+00> : vector<16x256xf32>
    %4 = tpu.matmul %1, %3, %cst {dimension_numbers = #tpu.dot_dimension_numbers<[1], [0], [0], [1], [0, 0, 1, 1], [], []>} : vector<16x72xbf16>, vector<72x256xbf16>, vector<16x256xf32> -> vector<16x256xf32>
    %c0_5 = arith.constant 0 : index
    %c1 = arith.constant 1 : index
    %c0_6 = arith.constant 0 : index
    %5 = vector.load %arg1[%c0_5, %c1, %c0_6] : memref<1x18x72xbf16, #tpu.memory_space<vmem>>, vector<1x16x72xbf16>
    %6 = vector.shape_cast %5 : vector<1x16x72xbf16> to vector<16x72xbf16>
    %c1_7 = arith.constant 1 : index
    %c0_8 = arith.constant 0 : index
    %c0_9 = arith.constant 0 : index
    %7 = vector.load %arg2[%c1_7, %c0_8, %c0_9] : memref<3x72x256xbf16, #tpu.memory_space<vmem>>, vector<1x72x256xbf16>
    %8 = vector.shape_cast %7 : vector<1x72x256xbf16> to vector<72x256xbf16>
    %cst_10 = arith.constant dense<0.000000e+00> : vector<16x256xf32>
    %9 = tpu.matmul %6, %8, %cst_10 {dimension_numbers = #tpu.dot_dimension_numbers<[1], [0], [0], [1], [0, 0, 1, 1], [], []>} : vector<16x72xbf16>, vector<72x256xbf16>, vector<16x256xf32> -> vector<16x256xf32>
    %10 = arith.addf %4, %9 : vector<16x256xf32>
    %c0_11 = arith.constant 0 : index
    %c2 = arith.constant 2 : index
    %c0_12 = arith.constant 0 : index
    %11 = vector.load %arg1[%c0_11, %c2, %c0_12] : memref<1x18x72xbf16, #tpu.memory_space<vmem>>, vector<1x16x72xbf16>
    %12 = vector.shape_cast %11 : vector<1x16x72xbf16> to vector<16x72xbf16>
    %c2_13 = arith.constant 2 : index
    %c0_14 = arith.constant 0 : index
    %c0_15 = arith.constant 0 : index
    %13 = vector.load %arg2[%c2_13, %c0_14, %c0_15] : memref<3x72x256xbf16, #tpu.memory_space<vmem>>, vector<1x72x256xbf16>
    %14 = vector.shape_cast %13 : vector<1x72x256xbf16> to vector<72x256xbf16>
    %cst_16 = arith.constant dense<0.000000e+00> : vector<16x256xf32>
    %15 = tpu.matmul %12, %14, %cst_16 {dimension_numbers = #tpu.dot_dimension_numbers<[1], [0], [0], [1], [0, 0, 1, 1], [], []>} : vector<16x72xbf16>, vector<72x256xbf16>, vector<16x256xf32> -> vector<16x256xf32>
    %16 = arith.addf %10, %15 : vector<16x256xf32>
    %c0_17 = arith.constant 0 : index
    %c0_18 = arith.constant 0 : index
    %17 = vector.load %arg3[%c0_17, %c0_18] : memref<1x256xf32, #tpu.memory_space<vmem>>, vector<1x256xf32>
    %18 = vector.broadcast %17 : vector<1x256xf32> to vector<16x256xf32>
    %19 = arith.addf %16, %18 : vector<16x256xf32>
    %c0_19 = arith.constant 0 : index
    %c0_20 = arith.constant 0 : index
    %20 = memref.load %arg4[%c0_19, %c0_20] : memref<1x1xf32, #tpu.memory_space<smem>>
    %cst_21 = arith.constant 0.000000e+00 : f32
    %21 = vector.broadcast %cst_21 : f32 to vector<16x256xf32>
    %22 = arith.cmpf ogt, %19, %21 : vector<16x256xf32>
    %23 = vector.broadcast %20 : f32 to vector<16x256xf32>
    %24 = arith.mulf %23, %19 : vector<16x256xf32>
    %25 = arith.select %22, %19, %24 : vector<16x256xi1>, vector<16x256xf32>
    %c0_22 = arith.constant 0 : index
    %c0_23 = arith.constant 0 : index
    %c0_24 = arith.constant 0 : index
    %26 = vector.load %arg5[%c0_22, %c0_23, %c0_24] : memref<1x16x256xf32, #tpu.memory_space<vmem>>, vector<1x16x256xf32>
    %27 = vector.shape_cast %26 : vector<1x16x256xf32> to vector<16x256xf32>
    %28 = vector.shape_cast %25 : vector<16x256xf32> to vector<1x16x256xf32>
    tpu.vector_store %arg5[%c0_22, %c0_23, %c0_24], %28 {strides = array<i32>} : memref<1x16x256xf32, #tpu.memory_space<vmem>>, vector<1x16x256xf32>,
    return
  }
  func.func @transform_0(%arg0: i32) -> (i32, i32, i32) {
    %c0_i32 = arith.constant 0 : i32
    %c0_i32_0 = arith.constant 0 : i32
    %c0_i32_1 = arith.constant 0 : i32
    return %arg0, %c0_i32, %c0_i32_0 : i32, i32, i32
  }
  func.func @transform_1(%arg0: i32) -> (i32, i32, i32) {
    %c0_i32 = arith.constant 0 : i32
    %c0_i32_0 = arith.constant 0 : i32
    %c0_i32_1 = arith.constant 0 : i32
    %c0_i32_2 = arith.constant 0 : i32
    return %c0_i32, %c0_i32_0, %c0_i32_1 : i32, i32, i32
  }
  func.func @transform_2(%arg0: i32) -> (i32, i32) {
    %c0_i32 = arith.constant 0 : i32
    %c0_i32_0 = arith.constant 0 : i32
    %c0_i32_1 = arith.constant 0 : i32
    return %c0_i32, %c0_i32_0 : i32, i32
  }
  func.func @transform_3(%arg0: i32) -> (i32, i32) {
    %c0_i32 = arith.constant 0 : i32
    %c0_i32_0 = arith.constant 0 : i32
    %c0_i32_1 = arith.constant 0 : i32
    return %c0_i32, %c0_i32_0 : i32, i32
  }
  func.func @transform_4(%arg0: i32) -> (i32, i32, i32) {
    %c0_i32 = arith.constant 0 : i32
    %c0_i32_0 = arith.constant 0 : i32
    %c0_i32_1 = arith.constant 0 : i32
    return %arg0, %c0_i32, %c0_i32_0 : i32, i32, i32
  }
}

</mosaic_0001>

<bundles_post_ra>
// kernel: scale_pixel_conv_block.1
= control target key start
LH: loop header
LB: loop body
LE: loop exit
PB: predicated region body
PF: predicated region fallthrough
CT: control target
= control target key end

     0   :  { %s806_s17 = smov 0   ;;  %s929_s0 = inlined_call_operand.vmem [shape: bf16[2,18,72], index: 0, kind: input, shape index: {}]   ;;  %s930_s1 = inlined_call_operand.vmem [shape: bf16[3,72,256], index: 1, kind: input, shape index: {}]   ;;  %s931_s2 = inlined_call_operand.vmem [shape: f32[1,256], index: 2, kind: input, shape index: {}]   ;;  %s932_s3 = inlined_call_operand.<no memory space> [shape: f32[1,1], index: 3, kind: input, shape index: {}]   ;;  %s933_s4 = inlined_call_operand.vmem [shape: f32[2,16,256], index: 4, kind: output, shape index: {}]  }
   0x1   :  { %9 = sst [smem:[#allocation2]] %s932_s3 }
   0x2 LB: > { %s646_s18 = sadd.s32 4294967295, %s775_s17   ;;  %p650_p0 = scmp.ge.s32.totalorder %s775_s17, 1  ;;  %s775_s17 = sphi %s806_s17, %s15_s17  }
   0x3   : > { %p163_p1 = scmp.lt.s32.totalorder %s775_s17, 3 }
   0x5   : > { %p164_p2 = pnand %p650_p0, %p163_p1 }
   0x6   : > { %p189_p3 = scmp.lt.s32.totalorder (!%p164_p2), %s646_s18, 1 }
   0x7   : > { %167 = sbr.rel (%p164_p2) target bundleno = 263 (0x107), region = 36 }
   0xc   : > { %v662_v0 = vld [vmem:[%s930_s1 + $0x88] sm:$0xff]  ;;  %vm292_vm0 = vcmask 1043456   ;;  %v210_v1 = vld [vmem:[%s930_s1 + $0x40] sm:$0xff]  ;;  %v777_v7 = vmov 0   ;;  %v730_v8 = vld [vmem:[%s930_s1 + $0x34] ss:$8 sps:$4 sm:$0xff]   ;;  %v559_v54 = vlaneseq }
   0xd   : > { %v674_v2 = vcombine.high %v662_v0, %v662_v0  ;;  %v686_v3 = vcombine.high %v210_v1, %v210_v1  ;;  %v673_v4 = vcombine.low %v662_v0, %v662_v0  ;;  %v685_v5 = vcombine.low %v210_v1, %v210_v1  ;;  %v728_v6 = vld [vmem:[%s930_s1 + $0x7c] ss:$8 sps:$4 sm:$0xff]   ;;  %331 = vmatprep.mubr.bf16.mxu0 %v777_v7  ;;  %s935_s18 = smov (!%p189_p3, %s646_s18), 1  ;;  %v732_v11 = vld [vmem:[%s930_s1 + $0x78] ss:$8 sps:$4 sm:$0xff]   ;;  %v697_v30 = vld [vmem:[%s930_s1 + $0xd0] sm:$0xff] }
   0xe   : > { %427 = vmatprep.mubr.bf16.mxu1 %v777_v7  ;;  %v733_v12 = vld [vmem:[%s930_s1 + $0x30] ss:$8 sps:$4 sm:$0xff]   ;;  %s714_s30 = smul.u32 12, %s935_s18  ;;  %v734_v13 = vld [vmem:[%s930_s1 + $0x6c] ss:$8 sps:$4 sm:$0xff]   ;;  %v708_v35 = vcombine.high %v697_v30, %v697_v30  ;;  %v707_v36 = vcombine.low %v697_v30, %v697_v30  ;;  %vm288_vm2 = vcmask 588800  }
   0xf   : > { %675 = vmatprep.subr.msk.bf16.mxu0 %vm292_vm0, %v674_v2  ;;  %687 = vmatprep.subr.msk.bf16.mxu1 %vm292_vm0, %v686_v3  ;;  %v294_v9 = vsel %vm292_vm0, %v673_v4, 0  ;;  %v390_v10 = vsel %vm292_vm0, %v685_v5, 0  ;;  %v736_v14 = vld [vmem:[%s930_s1 + $0x24] ss:$8 sps:$4 sm:$0xff]   ;;  %v738_v15 = vld [vmem:[%s930_s1 + $0x68] ss:$8 sps:$4 sm:$0xff]  }
  0x10   : > { %306 = vmatpush1.bf16.msra.mxu0 %v294_v9  ;;  %402 = vmatpush1.bf16.msra.mxu1 %v390_v10  ;;  %v739_v16 = vld [vmem:[%s930_s1 + $0x20] ss:$8 sps:$4 sm:$0xff]   ;;  %v740_v17 = vld [vmem:[%s930_s1 + $0x5c] ss:$8 sps:$4 sm:$0xff]   ;;  %s859_s19 = scalar_lea.vmem %s929_s0, %s714_s30  ;;  %v745_v20 = vld [vmem:[%s930_s1 + $0x10] ss:$8 sps:$4 sm:$0xff]  }
  0x11   : > { %307 = vmatprep.subr.bf16.mxu0 %v728_v6  ;;  %403 = vmatprep.subr.bf16.mxu1 %v730_v8  ;;  %v742_v18 = vld [vmem:[%s930_s1 + $0x14] ss:$8 sps:$4 sm:$0xff]   ;;  %v744_v19 = vld [vmem:[%s930_s1 + $0x58] ss:$8 sps:$4 sm:$0xff]   ;;  %v201_v23 = vld [vmem:[%s859_s19 + $0x4] sm:$0xf] }
  0x12   : > { %v746_v21 = vld [vmem:[%s930_s1 + $0x4c] ss:$8 sps:$4 sm:$0xff]   ;;  %v200_v22 = vld [vmem:[%s859_s19] sm:$0xf]  ;;  %v750_v31 = vld [vmem:[%s930_s1 + $0x48] ss:$8 sps:$4 sm:$0xff]  }
  0x13   : > { %v663_v24 = vcombine.low %v200_v22, %v201_v23  ;;  %v753_v25 = vld [vmem:[%s859_s19 + $0x8] ss:$0 sps:$4 sm:$0x11]   ;;  %v748_v26 = vld [vmem:[%s930_s1 + $0x4] ss:$8 sps:$4 sm:$0xff]   ;;  %v505_v39 = vsel %vm292_vm0, %v707_v36, 0 }
  0x14   : > { %308 = vmatpush1.bf16.msra.mxu0 %v732_v11  ;;  %404 = vmatpush1.bf16.msra.mxu1 %v733_v12  ;;  %v239_v29 = vshll.u32 %v753_v25, 16  ;;  %v751_v32 = vld [vmem:[%s930_s1] ss:$8 sps:$4 sm:$0xff]   ;;  %vm230_vm1 = vsmask.f32 7424  ;;  %v454_v51 = vrot.slane %v753_v25, 1 }
  0x15   : > { %309 = vmatprep.subr.bf16.mxu0 %v734_v13  ;;  %405 = vmatprep.subr.bf16.mxu1 %v736_v14  ;;  %v232_v27 = vshrl.u32 %v663_v24, 16  ;;  %v234_v28 = vshll.u32 %v663_v24, 16  ;;  %v758_v40 = vld [vmem:[%s930_s1 + $0xc4] ss:$8 sps:$4 sm:$0xff]   ;;  %v756_v41 = vld [vmem:[%s930_s1 + $0xc0] ss:$8 sps:$4 sm:$0xff]  }
  0x16   : > { %v241_v34 = vrot.slane %v239_v29, 1  ;;  %v761_v42 = vld [vmem:[%s930_s1 + $0xb4] ss:$8 sps:$4 sm:$0xff]   ;;  %v759_v43 = vld [vmem:[%s930_s1 + $0xb0] ss:$8 sps:$4 sm:$0xff]   ;;  %vm452_vm3 = vcmask 1046528  }
  0x17   : > { %v236_v33 = vrot.slane %v234_v28, 1  ;;  %v764_v44 = vld [vmem:[%s930_s1 + $0xa4] ss:$8 sps:$4 sm:$0xff]   ;;  %v438_v45 = vld [vmem:[%s859_s19] sm:$0xe]  ;;  %v560_v57 = vshrl.u32 %v559_v54, 7 }
  0x18   : > { %310 = vmatpush1.bf16.msra.mxu0 %v738_v15  ;;  %406 = vmatpush1.bf16.msra.mxu1 %v739_v16  ;;  %v762_v46 = vld [vmem:[%s930_s1 + $0xa0] ss:$8 sps:$4 sm:$0xff]   ;;  %v698_v47 = vcombine.low %v438_v45, %v201_v23  ;;  %v767_v48 = vld [vmem:[%s930_s1 + $0x94] ss:$8 sps:$4 sm:$0xff]   ;;  %v765_v49 = vld [vmem:[%s930_s1 + $0x90] ss:$8 sps:$4 sm:$0xff]  }
  0x19   : > { %311 = vmatprep.subr.bf16.mxu0 %v740_v17  ;;  %407 = vmatprep.subr.bf16.mxu1 %v742_v18  ;;  %v237_v37 = vor.u32 %v236_v33, %v232_v27  ;;  %s573_s19 = sld [smem:[#allocation2]]  ;;  %v561_v60 = vsub.s32 0, %v560_v57  ;;  %v557_v61 = vld [vmem:[%s931_s2] sm:$0x3]  ;;  %v565_v62 = vsub.s32 1, %v560_v57  ;;  %s713_s29 = sshll.u32 %s935_s18, 5 }
  0x1a   : > { %v453_v50 = vrot.slane %v698_v47, 1  ;;  %s198_s6 = scalar_lea.vmem %s933_s4, %s713_s29 }
  0x1b   : > { %v242_v38 = vsel %vm230_vm1, %v237_v37, %v241_v34  ;;  %v562_v2 = vrot.slane %v557_v61, %v561_v60  ;;  %v566_v6 = vrot.slane %v557_v61, %v565_v62 }
  0x1c   : > { %312 = vmatpush1.bf16.msra.mxu0 %v744_v19  ;;  %408 = vmatpush1.bf16.msra.mxu1 %v745_v20  ;;  %v455_v52 = vsel %vm452_vm3, %v453_v50, %v454_v51 }
  0x1d   : > { %313 = vmatprep.subr.bf16.mxu0 %v746_v21  ;;  %409 = vmatprep.subr.bf16.mxu1 %v748_v26 }
  0x20   : > { %314 = vmatpush1.bf16.msra.mxu0 %v750_v31  ;;  %410 = vmatpush1.bf16.msra.mxu1 %v751_v32 }
  0x21   : > { %709 = vmatprep.subr.msk.bf16.mxu0 %vm292_vm0, %v708_v35 }
  0x23   : > { %676 = vmatmul.mubr.msk.bf16.vlgmr.msra.gmra.mxu0 %vm288_vm2, %v242_v38  ;;  %688 = vmatmul.mubr.msk.bf16.vlgmr.msra.gmra.mxu1 %vm288_vm2, %v663_v24 }
  0x24   : > { %517 = vmatpush1.bf16.msra.mxu0 %v505_v39  ;;  %542 = vmatprep.mubr.bf16.mxu0 %v777_v7  ;;  %v578_v7 = vstv %s573_s19 }
  0x25   : > { %518 = vmatprep.subr.bf16.mxu0 %v758_v40 }
  0x28   : > { %519 = vmatpush1.bf16.msra.mxu0 %v756_v41 }
  0x29   : > { %520 = vmatprep.subr.bf16.mxu0 %v761_v42 }
  0x2c   : > { %521 = vmatpush1.bf16.msra.mxu0 %v759_v43 }
  0x2d   : > { %522 = vmatprep.subr.bf16.mxu0 %v764_v44 }
  0x30   : > { %523 = vmatpush1.bf16.msra.mxu0 %v762_v46 }
  0x31   : > { %524 = vmatprep.subr.bf16.mxu0 %v767_v48 }
  0x34   : > { %525 = vmatpush1.bf16.msra.mxu0 %v765_v49 }
  0x37   : > { %710 = vmatmul.mubr.msk.bf16.vlgmr.msra.gmra.mxu0 %vm288_vm2, %v455_v52 }
  0xe3   : > { %v333_v53 = vpop.f32.mrf.mxu0  ;;  %v429_v56 = vpop.f32.mrf.mxu1 }
  0xe4   : > { %v430_v0 = vadd.f32 %v429_v56, %v333_v53 }
  0xe5   : > { %v335_v55 = vpop.f32.mrf.mxu0  ;;  %v431_v59 = vpop.f32.mrf.mxu1 }
  0xe6   : > { %v432_v4 = vadd.f32 %v431_v59, %v335_v55 }
  0xe7   : > { %v337_v58 = vpop.f32.mrf.mxu0  ;;  %v433_v1 = vpop.f32.mrf.mxu1 }
  0xe8   : > { %v434_v9 = vadd.f32 %v433_v1, %v337_v58 }
  0xe9   : > { %v339_v63 = vpop.f32.mrf.mxu0  ;;  %v435_v10 = vpop.f32.mrf.mxu1 }
  0xea   : > { %v436_v17 = vadd.f32 %v435_v10, %v339_v63 }
  0xf7   : > { %v544_v3 = vpop.f32.mrf.mxu0 }
  0xf8   : > { %v553_v5 = vadd.f32 %v544_v3, %v430_v0 }
  0xf9   : > { %v546_v8 = vpop.f32.mrf.mxu0 }
  0xfa   : > { %v569_v11 = vadd.f32 %v562_v2, %v553_v5  ;;  %v554_v12 = vadd.f32 %v546_v8, %v432_v4 }
  0xfb   : > { %v548_v13 = vpop.f32.mrf.mxu0 }
  0xfc   : > { %vm574_vm4 = vcmp.gt.f32.partialorder %v569_v11, 0.0  ;;  %v579_v14 = vmul.f32 %v578_v7, %v569_v11  ;;  %v570_v15 = vadd.f32 %v566_v6, %v554_v12  ;;  %v555_v16 = vadd.f32 %v548_v13, %v434_v9 }
  0xfd   : > { %v550_v18 = vpop.f32.mrf.mxu0 }
  0xfe   : > { %v583_v19 = vsel %vm574_vm4, %v569_v11, %v579_v14  ;;  %vm575_vm5 = vcmp.gt.f32.partialorder %v570_v15, 0.0  ;;  %v580_v20 = vmul.f32 %v578_v7, %v570_v15  ;;  %v571_v21 = vadd.f32 %v562_v2, %v555_v16 }
  0xff   : > { %587 = vst [vmem:[%s198_s6] sm:$0xff] %v583_v19  ;;  %v556_v22 = vadd.f32 %v550_v18, %v436_v17 }
 0x100   : > { %v584_v23 = vsel %vm575_vm5, %v570_v15, %v580_v20  ;;  %vm576_vm6 = vcmp.gt.f32.partialorder %v571_v21, 0.0  ;;  %v581_v24 = vmul.f32 %v578_v7, %v571_v21 }
 0x101   : > { %588 = vst [vmem:[%s198_s6 + $0x8] sm:$0xff] %v584_v23  ;;  %v572_v25 = vadd.f32 %v566_v6, %v556_v22 }
 0x102   : > { %v585_v26 = vsel %vm576_vm6, %v571_v21, %v581_v24 }
 0x103   : > { %589 = vst [vmem:[%s198_s6 + $0x10] sm:$0xff] %v585_v26  ;;  %vm577_vm7 = vcmp.gt.f32.partialorder %v572_v25, 0.0  ;;  %v582_v27 = vmul.f32 %v578_v7, %v572_v25 }
 0x105   : > { %v586_v28 = vsel %vm577_vm7, %v572_v25, %v582_v27 }
 0x106   : > { %590 = vst [vmem:[%s198_s6 + $0x18] sm:$0xff] %v586_v28 }
 0x107 PF: > { %s15_s17 = sadd.s32 1, %s775_s17  }
 0x108   : > { %p12_p4 = scmp.ge.s32.totalorder %s15_s17, 4  }
 0x10a   :  { %14 = sbr.rel (!%p12_p4) target bundleno = 2 (0x2), region = 68 }

</bundles_post_ra>
